<compile_context>
chip_gen: v7x
topology: tpu7x:2x2x1
jax: 0.10.0
libtpu: 0.0.40
codegen_flags: <defaults>
</compile_context>

<pallas_src>
import jax
import jax.numpy as jnp
from jax.experimental import pallas as pl
from jax.experimental.pallas import tpu as pltpu

_B_CONST = 0.001   # module's smoothing constant b
_WIDE = 1024       # slab lane width (8 * 128), lane-dense stores
_SUBLANES = 8


def _target_block_bytes():
    """Per-input-block byte target, tuned per TPU generation."""
    try:
        kind = jax.devices()[0].device_kind.lower()
    except Exception:  # pragma: no cover - defensive; fall back to a safe default
        kind = ""
    if "v7" in kind:
        return 4 << 20   # ~3.2 TB/s HBM: big blocks amortize ~0.35us/step overhead
    if "v5" in kind:
        return 1 << 20   # 16 MiB scoped-VMEM default; ~820 GB/s already near roofline
    return 2 << 20       # v6e and unknown chips


def _approx_softshrink_kernel(params_ref, x_ref, o_ref):
    # params_ref: SMEM f32[2] = [lambd^2 + b, 2*lambd]
    # x_ref / o_ref: (tile_rows, 1024) VMEM tiles in the input/output dtype.
    x = x_ref[...].astype(jnp.float32)   # f32 internal math even for bf16/fp16
    c = params_ref[0]
    two_lam = params_ref[1]
    s = x * x + c            # shared x*x: s -/+ t == (x -/+ lambd)^2 + b
    t = two_lam * x
    y = x + jnp.float32(0.5) * (jnp.sqrt(s - t) - jnp.sqrt(s + t))
    o_ref[...] = y.astype(o_ref.dtype)


def _choose_tile_rows(rows, itemsize):
    target_rows = max(_SUBLANES, _target_block_bytes() // (_WIDE * itemsize))
    tile = min(rows, target_rows)
    if rows >= 2 * _SUBLANES:
        # Guarantee >= 2 grid blocks so "parallel" can shard over both v7x TCs.
        tile = min(tile, rows // 2)
    if tile < _SUBLANES:
        # rows < 8: block must equal the full array extent.
        return rows
    return (tile // _SUBLANES) * _SUBLANES


def _softshrink_jnp(x, lam_f32):
    """Plain-jnp fallback (tiny tails / tensors), f32 math, original dtype out."""
    x32 = x.astype(jnp.float32)
    b = jnp.float32(_B_CONST)
    lo = x32 - lam_f32
    hi = x32 + lam_f32
    y = x32 + 0.5 * (jnp.sqrt(lo * lo + b) - jnp.sqrt(hi * hi + b))
    return y.astype(x.dtype)


def _run_slab(x2d, params, tile_rows, vmem_limit):
    rows = x2d.shape[0]
    grid = (pl.cdiv(rows, tile_rows),)   # ragged final block is masked by Pallas
    return pl.pallas_call(
        _approx_softshrink_kernel,
        out_shape=jax.ShapeDtypeStruct((rows, _WIDE), x2d.dtype),
        grid_spec=pl.GridSpec(
            grid=grid,
            in_specs=[
                pl.BlockSpec(memory_space=pltpu.MemorySpace.SMEM),   # [c, 2*lambd]
                pl.BlockSpec((tile_rows, _WIDE), lambda i: (i, 0)),  # x tile
            ],
            out_specs=pl.BlockSpec((tile_rows, _WIDE), lambda i: (i, 0)),
        ),
        compiler_params=pltpu.CompilerParams(
            dimension_semantics=("parallel",),   # lets v7x shard over both TCs
            vmem_limit_bytes=vmem_limit,
        ),
    )(params, x2d)


def approx_soft_shrink_act(x, threshold):
    """Pallas TPU implementation of ApproxSoftShrinkAct.forward(x, threshold)."""
    orig_shape = x.shape
    orig_dtype = x.dtype
    n_elems = x.size
    if n_elems == 0:
        return x

    lam = jnp.asarray(threshold, dtype=jnp.float32)
    params = jnp.stack([lam * lam + jnp.float32(_B_CONST),
                        jnp.float32(2.0) * lam]).reshape(2)

    prefix = (n_elems // _WIDE) * _WIDE
    if prefix == 0:
        # Tiny tensor (< 1024 elements): not worth a kernel launch.
        return _softshrink_jnp(x.reshape(-1), lam).reshape(orig_shape)

    itemsize = jnp.dtype(orig_dtype).itemsize
    rows = prefix // _WIDE
    tile_rows = _choose_tile_rows(rows, itemsize)
    block_bytes = tile_rows * _WIDE * itemsize
    vmem_limit = int(max(4 * block_bytes + (4 << 20), 16 << 20))

    if prefix == n_elems:
        # Aligned fast path: free reshape, exactly one HBM read + one write.
        x2d = x.reshape(rows, _WIDE)
        out2d = _run_slab(x2d, params, tile_rows, vmem_limit)
        return out2d.reshape(orig_shape)

    # Ragged path: kernel on the aligned prefix, <=1023-element tail in jnp.
    x_flat = x.reshape(-1)
    head = x_flat[:prefix].reshape(rows, _WIDE)
    head_out = _run_slab(head, params, tile_rows, vmem_limit).reshape(-1)
    tail_out = _softshrink_jnp(x_flat[prefix:], lam)
    return jnp.concatenate([head_out, tail_out]).reshape(orig_shape)


def _reference(x, threshold, b=_B_CONST):
    x = x.astype(jnp.float32)
    lam = jnp.float32(threshold)
    return x + 0.5 * (jnp.sqrt((x - lam) ** 2 + b) - jnp.sqrt((x + lam) ** 2 + b))


if __name__ == "__main__":
    threshold = 0.1
    k0, k1, k2, k3 = jax.random.split(jax.random.PRNGKey(0), 4)

    # Primary NCHW test: 2*4*16*16 = 2048 elements (aligned fast path).
    x = jax.random.normal(k0, (2, 4, 16, 16), dtype=jnp.float32)
    y = jax.block_until_ready(approx_soft_shrink_act(x, threshold))
    assert y.shape == x.shape and y.dtype == x.dtype
    assert jnp.allclose(y, _reference(x, threshold), atol=1e-5, rtol=1e-5)

    # Larger tensor: exercises the multi-block grid (>=2 blocks for dual-TC v7x).
    xb = jax.random.normal(k1, (4, 8, 32, 32), dtype=jnp.float32)
    yb = jax.block_until_ready(approx_soft_shrink_act(xb, threshold))
    assert yb.shape == xb.shape
    assert jnp.allclose(yb, _reference(xb, threshold), atol=1e-5, rtol=1e-5)

    # Awkward element count (3*5*7*11 = 1155): prefix kernel + jnp tail path.
    x2 = jax.random.normal(k2, (3, 5, 7, 11), dtype=jnp.float32)
    y2 = jax.block_until_ready(approx_soft_shrink_act(x2, threshold))
    assert y2.shape == x2.shape
    assert jnp.allclose(y2, _reference(x2, threshold), atol=1e-5, rtol=1e-5)

    # bf16 input: narrow-dtype DMA, float32 internal math, bf16 output.
    x3 = jax.random.normal(k3, (2, 4, 16, 16), dtype=jnp.bfloat16)
    y3 = jax.block_until_ready(approx_soft_shrink_act(x3, threshold))
    assert y3.dtype == jnp.bfloat16
    assert jnp.allclose(y3.astype(jnp.float32), _reference(x3, threshold),
                        atol=2e-2, rtol=2e-2)

    print("KERNEL_OK")
</pallas_src>

<mosaic_0001>
module attributes {stable_mosaic.version = 11 : i64} {
  func.func @_approx_softshrink_kernel(%arg0: i32, %arg1: memref<2xf32, #tpu.memory_space<smem>>, %arg2: memref<2x1024xf32, #tpu.memory_space<vmem>>, %arg3: memref<2x1024xf32, #tpu.memory_space<vmem>>) attributes {dimension_semantics = [#tpu.dimension_semantics<parallel>], iteration_bounds = array<i64: 1>, scalar_prefetch = 0 : i64, scratch_operands = 0 : i64, tpu.core_type = #tpu.core_type<tc>, window_params = [{transform_indices = @transform_0, window_bounds = array<i64: 2>}, {transform_indices = @transform_1, window_bounds = array<i64: 2, 1024>}, {transform_indices = @transform_2, window_bounds = array<i64: 2, 1024>}]} {
    %c0 = arith.constant 0 : index
    %c0_0 = arith.constant 0 : index
    %0 = vector.load %arg2[%c0, %c0_0] : memref<2x1024xf32, #tpu.memory_space<vmem>>, vector<2x1024xf32>
    %c0_1 = arith.constant 0 : index
    %1 = memref.load %arg1[%c0_1] : memref<2xf32, #tpu.memory_space<smem>>
    %c1 = arith.constant 1 : index
    %2 = memref.load %arg1[%c1] : memref<2xf32, #tpu.memory_space<smem>>
    %3 = arith.mulf %0, %0 : vector<2x1024xf32>
    %4 = vector.broadcast %1 : f32 to vector<2x1024xf32>
    %5 = arith.addf %3, %4 : vector<2x1024xf32>
    %6 = vector.broadcast %2 : f32 to vector<2x1024xf32>
    %7 = arith.mulf %6, %0 : vector<2x1024xf32>
    %8 = arith.subf %5, %7 : vector<2x1024xf32>
    %9 = math.sqrt %8 : vector<2x1024xf32>
    %10 = arith.addf %5, %7 : vector<2x1024xf32>
    %11 = math.sqrt %10 : vector<2x1024xf32>
    %12 = arith.subf %9, %11 : vector<2x1024xf32>
    %cst = arith.constant 5.000000e-01 : f32
    %13 = vector.broadcast %cst : f32 to vector<2x1024xf32>
    %14 = arith.mulf %13, %12 : vector<2x1024xf32>
    %15 = arith.addf %0, %14 : vector<2x1024xf32>
    %c0_2 = arith.constant 0 : index
    %c0_3 = arith.constant 0 : index
    %16 = vector.load %arg3[%c0_2, %c0_3] : memref<2x1024xf32, #tpu.memory_space<vmem>>, vector<2x1024xf32>
    tpu.vector_store %arg3[%c0_2, %c0_3], %15 {strides = array<i32>} : memref<2x1024xf32, #tpu.memory_space<vmem>>, vector<2x1024xf32>,
    return
  }
  func.func @transform_0(%arg0: i32) -> i32 {
    %c0_i32 = arith.constant 0 : i32
    %c0_i32_0 = arith.constant 0 : i32
    return %c0_i32 : i32
  }
  func.func @transform_1(%arg0: i32) -> (i32, i32) {
    %c0_i32 = arith.constant 0 : i32
    %c0_i32_0 = arith.constant 0 : i32
    return %arg0, %c0_i32 : i32, i32
  }
  func.func @transform_2(%arg0: i32) -> (i32, i32) {
    %c0_i32 = arith.constant 0 : i32
    %c0_i32_0 = arith.constant 0 : i32
    return %arg0, %c0_i32 : i32, i32
  }
}

</mosaic_0001>

<bundles_post_ra>
// kernel: tpu_custom_call.1
= control target key start
LH: loop header
LB: loop body
LE: loop exit
PB: predicated region body
PF: predicated region fallthrough
CT: control target
= control target key end

     0   :  { %7 = vsyncpa [#allocation5], 0  ;;  %s231_s0 = inlined_call_operand.hbm [shape: f32[2], index: 0, kind: input, shape index: {}]   ;;  %s232_s1 = inlined_call_operand.hbm [shape: f32[2,1024], index: 1, kind: input, shape index: {}]   ;;  %s233_s2 = inlined_call_operand.hbm [shape: f32[2,1024], index: 2, kind: output, shape index: {}]  }
   0x1   :  { %8 = vsyncpa [#allocation3], 0 }
   0x2   :  { %9 = vsyncpa [#allocation4], 0  ;;  %s115_s11 = scalar_lea.hbm %s231_s0, 16 }
   0x3   :  { %p116_p0 = scmp.ne.s32.totalorder %s231_s0, %s115_s11  ;;  %p119_p1 = scmp.lt.u32.totalorder %s115_s11, %s231_s0 }
   0x5   :  { %p121_p2 = pnand %p119_p1, %p116_p0 }
   0x7   :  { %124 = shalt.err (!%p121_p2)
}
   0x8   :  { %s175_s16 = smov [#allocation2]   ;;  %s176_s19 = smov [#allocation6]  }
   0x9   :  { %17 = dma.hbm_to_smem %s231_s0, 16, %s175_s16, [#allocation5]  }
   0xa   :  { %s24_s20 = sshll.u32 %s176_s19, 4  ;;  %s125_s23 = scalar_lea.hbm %s232_s1, 256  ;;  %s25_s20 = int_to_ptr.vmem [resolvable:$true] %s24_s20 }
   0xb   :  { %p126_p3 = scmp.ne.s32.totalorder %s232_s1, %s125_s23  ;;  %p129_p4 = scmp.lt.u32.totalorder %s125_s23, %s232_s1 }
   0xd   :  { %p131_p5 = pnand %p129_p4, %p126_p3 }
   0xf   :  { %134 = shalt.err (!%p131_p5)
}
  0x10   :  { %s135_s28 = scalar_lea.vmem %s25_s20, 256  ;;  %p140_p7 = scmp.lt.s32.totalorder %s25_s20, %s25_s20 }
  0x11   :  { %p136_p6 = scmp.ne.s32.totalorder %s25_s20, %s135_s28  ;;  %p141_p8 = scmp.lt.s32.totalorder %s135_s28, %s135_s28 }
  0x13   :  { %p142_p9 = por %p141_p8, %p140_p7 }
  0x15   :  { %p143_p10 = pnand %p142_p9, %p136_p6 }
  0x17   :  { %146 = shalt.err (!%p143_p10)
}
  0x18   :  { %27 = dma.hbm_to_vmem [thread:$0]  %s232_s1, 256, %s25_s20, [#allocation3]  }
  0x19   :  { %169 = dma.done.wait [#allocation5], 16  }
  0x1a   :  { %170 = vsyncadd [#allocation5], 4294967280 }
  0x1b   :  { %171 = dma.done.wait [#allocation3], 256  }
  0x1c   :  { %172 = vsyncadd [#allocation3], 4294967040 }
  0x1d   :  { %34 = sfence }
  0x1e   :  { %v35_v0 = vld [vmem:[#allocation6] sm:$0xff]  ;;  %s37_s30 = sld [smem:[#allocation2]]  ;;  %s103_s3 = sld [smem:[#allocation2 + $0x1]]  ;;  %v36_v1 = vld [vmem:[#allocation6 + $0x8] sm:$0xff] }
  0x1f   :  { %v39_v2 = vmul.f32 %v35_v0, %v35_v0  ;;  %v40_v3 = vmul.f32 %v36_v1, %v36_v1  ;;  %s177_s1 = smov [#allocation7]  }
  0x20   :  { %s93_s4 = sshll.u32 %s177_s1, 4  ;;  %s94_s4 = int_to_ptr.vmem [resolvable:$true] %s93_s4 }
  0x21   :  { %s147_s5 = scalar_lea.vmem %s94_s4, 256  ;;  %p152_p12 = scmp.lt.s32.totalorder %s94_s4, %s94_s4 }
  0x22   :  { %p148_p11 = scmp.ne.s32.totalorder %s94_s4, %s147_s5  ;;  %p153_p13 = scmp.lt.s32.totalorder %s147_s5, %s147_s5 }
  0x24   :  { %v41_v4 = vstv %s37_s30  ;;  %v44_v5 = vstv %s103_s3  ;;  %p154_p0 = por %p153_p13, %p152_p12 }
  0x25   :  { %v42_v6 = vadd.f32 %v41_v4, %v39_v2  ;;  %v45_v7 = vmul.f32 %v44_v5, %v35_v0  ;;  %v43_v8 = vadd.f32 %v41_v4, %v40_v3  ;;  %v46_v9 = vmul.f32 %v44_v5, %v36_v1 }
  0x26   :  { %p155_p1 = pnand %p154_p0, %p148_p11 }
  0x27   :  { %v47_v10 = vsub.f32 %v42_v6, %v45_v7  ;;  %v63_v11 = vadd.f32 %v45_v7, %v42_v6  ;;  %v48_v12 = vsub.f32 %v43_v8, %v46_v9  ;;  %v64_v13 = vadd.f32 %v46_v9, %v43_v8 }
  0x29   :  { %107 = vrsqrt.f32 %v47_v10  ;;  %vm51_vm0 = vcmp.eq.f32.partialorder %v47_v10, inf  ;;  %vm53_vm1 = vcmp.eq.f32.partialorder %v47_v10, 0.0  ;;  %v54_v15 = vand.u32 2147483648, %v47_v10 }
  0x2a   :  { %109 = vrsqrt.f32 %v63_v11  ;;  %vm67_vm2 = vcmp.eq.f32.partialorder %v63_v11, inf  ;;  %vm69_vm3 = vcmp.eq.f32.partialorder %v63_v11, 0.0  ;;  %v70_v18 = vand.u32 2147483648, %v63_v11 }
  0x2b   :  { %111 = vrsqrt.f32 %v48_v12  ;;  %vm58_vm4 = vcmp.eq.f32.partialorder %v48_v12, inf  ;;  %vm60_vm5 = vcmp.eq.f32.partialorder %v48_v12, 0.0  ;;  %v61_v21 = vand.u32 2147483648, %v48_v12 }
  0x2c   :  { %113 = vrsqrt.f32 %v64_v13  ;;  %vm74_vm6 = vcmp.eq.f32.partialorder %v64_v13, inf  ;;  %v77_v25 = vand.u32 2147483648, %v64_v13  ;;  %vm76_vm7 = vcmp.eq.f32.partialorder %v64_v13, 0.0 }
  0x33   :  { %v108_v14 = vpop.eup %107 }
  0x34   :  { %v110_v16 = vpop.eup %109  ;;  %v50_v17 = vmul.f32 %v108_v14, %v47_v10 }
  0x35   :  { %v112_v19 = vpop.eup %111  ;;  %v66_v20 = vmul.f32 %v110_v16, %v63_v11 }
  0x36   :  { %v114_v22 = vpop.eup %113  ;;  %v52_v23 = vsel %vm51_vm0, %v47_v10, %v50_v17  ;;  %v57_v24 = vmul.f32 %v112_v19, %v48_v12 }
  0x37   :  { %v55_v26 = vsel %vm53_vm1, %v54_v15, %v52_v23  ;;  %v68_v27 = vsel %vm67_vm2, %v63_v11, %v66_v20  ;;  %v73_v28 = vmul.f32 %v114_v22, %v64_v13 }
  0x38   :  { %v71_v29 = vsel %vm69_vm3, %v70_v18, %v68_v27  ;;  %v59_v30 = vsel %vm58_vm4, %v48_v12, %v57_v24 }
  0x39   :  { %v79_v31 = vsub.f32 %v55_v26, %v71_v29  ;;  %v62_v32 = vsel %vm60_vm5, %v61_v21, %v59_v30  ;;  %v75_v33 = vsel %vm74_vm6, %v64_v13, %v73_v28 }
  0x3a   :  { %v78_v34 = vsel %vm76_vm7, %v77_v25, %v75_v33 }
  0x3b   :  { %v81_v35 = vmul.f32 0.5, %v79_v31  ;;  %v80_v36 = vsub.f32 %v62_v32, %v78_v34 }
  0x3d   :  { %v83_v37 = vadd.f32 %v81_v35, %v35_v0  ;;  %v82_v38 = vmul.f32 0.5, %v80_v36 }
  0x3f   :  { %85 = vst [vmem:[#allocation7] sm:$0xff] %v83_v37  ;;  %v84_v39 = vadd.f32 %v82_v38, %v36_v1 }
  0x41   :  { %86 = vst [vmem:[#allocation7 + $0x8] sm:$0xff] %v84_v39 }
  0x42   :  { %158 = shalt.err (!%p155_p1)
}
  0x43   :  { %s159_s8 = scalar_lea.hbm %s233_s2, 256 }
  0x44   :  { %p160_p2 = scmp.ne.s32.totalorder %s233_s2, %s159_s8  ;;  %p163_p3 = scmp.lt.u32.totalorder %s159_s8, %s233_s2 }
  0x46   :  { %p165_p4 = pnand %p163_p3, %p160_p2 }
  0x48   :  { %168 = shalt.err (!%p165_p4)
}
  0x49   :  { %96 = dma.vmem_to_hbm [thread:$0]  %s94_s4, 256, %s233_s2, [#allocation4]  }
  0x4a   :  { %173 = dma.done.wait [#allocation4], 256  }
  0x4b   :  { %174 = vsyncadd [#allocation4], 4294967040 }
  0x4c   :  { %100 = vsyncpa [#allocation3], 1 }
  0x4d   :  { %101 = vsyncpa [#allocation4], 1 }
  0x4e   :  { %102 = vsyncpa [#allocation5], 1 }

</bundles_post_ra>
